<compile_context>
chip_gen: v6e
topology: v6e:2x2x1
jax: 0.10.0
libtpu: 0.0.40
codegen_flags: <defaults>
</compile_context>

<pallas_src>
import functools

import jax
import jax.numpy as jnp
from jax.experimental import pallas as pl
from jax.experimental.pallas import tpu as pltpu


_LANE = 128
# One (1, C, T) slab of this size (in x dtype) still fits with double-buffered in/out
# (4x slab) under a modest scoped-VMEM limit on every generation, including v7x (64 MiB).
_RESIDENT_MAX_BYTES = 8 << 20
_VMEM_LIMIT_BYTES = 48 << 20
# Target bytes for one (C, TILE_T) pipeline buffer in the tiled path.
_TILE_TARGET_BYTES = 8 << 20
_MAX_TILE_T = 4096


def _round_up(a, m):
    return ((a + m - 1) // m) * m


# ----------------------------------------------------------------------------
# Fused (resident-slab) kernel: one batch element per grid step.
# ----------------------------------------------------------------------------
def _gln_fused_kernel(x_ref, gamma_ref, beta_ref, o_ref, *, eps, count):
    # Single-sweep statistics: s1 = sum(x), s2 = sum(x^2); f32 accumulation.
    x = x_ref[...].astype(jnp.float32)           # (1, C, T)
    s1 = jnp.sum(x)
    s2 = jnp.sum(x * x)
    mean = s1 / count
    var = jnp.maximum(s2 / count - mean * mean, 0.0)   # guard mild cancellation
    inv_std = jax.lax.rsqrt(var + eps)

    # Fold the affine into per-channel scale/shift: 2 VPU ops per element in the apply.
    scale = gamma_ref[...].astype(jnp.float32) * inv_std          # (C, 1)
    shift = beta_ref[...].astype(jnp.float32) - mean * scale      # (C, 1)

    o_ref[...] = (x_ref[...].astype(jnp.float32) * scale[None] + shift[None]).astype(o_ref.dtype)


# ----------------------------------------------------------------------------
# Tiled path, pass 1: per-batch mean / inv_std accumulated across T tiles.
# The two outputs double as the running sum / sum-of-squares accumulators
# (their block index is constant across the "arbitrary" T axis).
# ----------------------------------------------------------------------------
def _gln_stats_kernel(x_ref, mean_ref, istd_ref, *, eps, count):
    t = pl.program_id(1)

    @pl.when(t == 0)
    def _init():
        mean_ref[...] = jnp.zeros_like(mean_ref)   # running sum(x)
        istd_ref[...] = jnp.zeros_like(istd_ref)   # running sum(x*x)

    x = x_ref[...].astype(jnp.float32)             # (1, C, TILE_T), zero-padded tail is exact
    mean_ref[...] += jnp.sum(x, keepdims=True)
    istd_ref[...] += jnp.sum(x * x, keepdims=True)

    @pl.when(t == pl.num_programs(1) - 1)
    def _finalize():
        mean = mean_ref[...] / count
        var = jnp.maximum(istd_ref[...] / count - mean * mean, 0.0)
        mean_ref[...] = mean
        istd_ref[...] = jax.lax.rsqrt(var + eps)


# ----------------------------------------------------------------------------
# Tiled path, pass 2: y = x * scale + shift with per-(batch, channel) scale/shift.
# ----------------------------------------------------------------------------
def _gln_apply_kernel(x_ref, scale_ref, shift_ref, o_ref):
    x = x_ref[...].astype(jnp.float32)                        # (1, C, TILE_T)
    o_ref[...] = (x * scale_ref[...] + shift_ref[...]).astype(o_ref.dtype)


# ----------------------------------------------------------------------------
# Wrappers
# ----------------------------------------------------------------------------
def _gln_resident(x, gamma, beta, eps):
    N, C, T = x.shape
    kernel = functools.partial(_gln_fused_kernel, eps=eps, count=float(C * T))
    return pl.pallas_call(
        kernel,
        out_shape=jax.ShapeDtypeStruct((N, C, T), x.dtype),
        grid_spec=pltpu.PrefetchScalarGridSpec(
            num_scalar_prefetch=0,
            grid=(N,),
            in_specs=[
                pl.BlockSpec((1, C, T), lambda i: (i, 0, 0)),   # one batch slab
                pl.BlockSpec((C, 1), lambda i: (0, 0)),          # gamma (resident)
                pl.BlockSpec((C, 1), lambda i: (0, 0)),          # beta  (resident)
            ],
            out_specs=pl.BlockSpec((1, C, T), lambda i: (i, 0, 0)),
        ),
        compiler_params=pltpu.CompilerParams(
            dimension_semantics=("parallel",),
            vmem_limit_bytes=_VMEM_LIMIT_BYTES,
        ),
    )(x, gamma, beta)


def _choose_tile_t(C, t_pad, itemsize):
    """Largest lane-aligned T tile with one (C, TILE_T) buffer <= target bytes."""
    tile = min(_MAX_TILE_T, t_pad)
    tile = max(_LANE, (tile // _LANE) * _LANE)
    while tile > _LANE and C * tile * itemsize > _TILE_TARGET_BYTES:
        tile = max(_LANE, ((tile // 2) // _LANE) * _LANE)
    return tile


def _gln_tiled(x, gamma, beta, eps):
    N, C, T = x.shape
    itemsize = jnp.dtype(x.dtype).itemsize

    t_pad = _round_up(T, _LANE)
    tile_t = _choose_tile_t(C, t_pad, itemsize)
    t_pad = _round_up(t_pad, tile_t)
    if t_pad != T:
        # Zero padding is exact for sum / sum-of-squares since we divide by the true count.
        x_p = jnp.pad(x, ((0, 0), (0, 0), (0, t_pad - T)))
    else:
        x_p = x
    n_t = t_pad // tile_t
    count = float(C * T)

    # Pass 1: per-batch mean and inverse std.
    stats_kernel = functools.partial(_gln_stats_kernel, eps=eps, count=count)
    mean, inv_std = pl.pallas_call(
        stats_kernel,
        out_shape=(
            jax.ShapeDtypeStruct((N, 1, 1), jnp.float32),
            jax.ShapeDtypeStruct((N, 1, 1), jnp.float32),
        ),
        grid_spec=pltpu.PrefetchScalarGridSpec(
            num_scalar_prefetch=0,
            grid=(N, n_t),
            in_specs=[pl.BlockSpec((1, C, tile_t), lambda n, t: (n, 0, t))],
            out_specs=(
                pl.BlockSpec((1, 1, 1), lambda n, t: (n, 0, 0)),
                pl.BlockSpec((1, 1, 1), lambda n, t: (n, 0, 0)),
            ),
        ),
        compiler_params=pltpu.CompilerParams(
            dimension_semantics=("parallel", "arbitrary"),
            vmem_limit_bytes=_VMEM_LIMIT_BYTES,
        ),
    )(x_p)

    # Fold the affine once per (batch, channel): y = x * scale + shift  (tiny XLA op).
    scale = gamma.astype(jnp.float32)[None, :, :] * inv_std        # (N, C, 1)
    shift = beta.astype(jnp.float32)[None, :, :] - mean * scale    # (N, C, 1)

    # Pass 2: apply with lane-dense tiles (TILE_T is a multiple of 128).
    y = pl.pallas_call(
        _gln_apply_kernel,
        out_shape=jax.ShapeDtypeStruct((N, C, t_pad), x.dtype),
        grid_spec=pltpu.PrefetchScalarGridSpec(
            num_scalar_prefetch=0,
            grid=(N, n_t),
            in_specs=[
                pl.BlockSpec((1, C, tile_t), lambda n, t: (n, 0, t)),
                pl.BlockSpec((1, C, 1), lambda n, t: (n, 0, 0)),
                pl.BlockSpec((1, C, 1), lambda n, t: (n, 0, 0)),
            ],
            out_specs=pl.BlockSpec((1, C, tile_t), lambda n, t: (n, 0, t)),
        ),
        compiler_params=pltpu.CompilerParams(
            dimension_semantics=("parallel", "parallel"),
            vmem_limit_bytes=_VMEM_LIMIT_BYTES,
        ),
    )(x_p, scale, shift)

    if t_pad != T:
        y = y[:, :, :T]
    return y


def global_layer_norm(x, gamma, beta, *, eps=1e-5, force_tiled=False):
    """x: (N, C, T); gamma, beta: (C, 1). Returns (N, C, T)."""
    N, C, T = x.shape
    assert gamma.shape == (C, 1) and beta.shape == (C, 1)
    slab_bytes = C * T * jnp.dtype(x.dtype).itemsize
    if (not force_tiled) and slab_bytes <= _RESIDENT_MAX_BYTES:
        return _gln_resident(x, gamma, beta, eps)
    return _gln_tiled(x, gamma, beta, eps)


if __name__ == "__main__":
    # Small shapes consistent with the module: (batch=2, channels=8, frames=16).
    N, C, T = 2, 8, 16
    eps = 1e-5

    key = jax.random.PRNGKey(0)
    kx, kg, kb = jax.random.split(key, 3)
    x = jax.random.normal(kx, (N, C, T), dtype=jnp.float32)
    # Module init is gamma=ones(C,1), beta=zeros(C,1); perturb deterministically so the
    # (C,1) affine broadcast is actually exercised.
    gamma = 1.0 + 0.1 * jax.random.normal(kg, (C, 1), dtype=jnp.float32)
    beta = 0.1 * jax.random.normal(kb, (C, 1), dtype=jnp.float32)

    out_resident = global_layer_norm(x, gamma, beta, eps=eps)                  # fused slab path
    out_tiled = global_layer_norm(x, gamma, beta, eps=eps, force_tiled=True)   # tiled two-pass path
    jax.block_until_ready((out_resident, out_tiled))

    # Pure-JAX reference (matches the PyTorch forward).
    mean = jnp.mean(x, axis=(1, 2), keepdims=True)
    var = jnp.mean((x - mean) ** 2, axis=(1, 2), keepdims=True)
    ref = gamma[None] * (x - mean) / jnp.sqrt(var + eps) + beta[None]

    assert out_resident.shape == (N, C, T) and out_tiled.shape == (N, C, T)
    assert jnp.allclose(out_resident, ref, atol=1e-4, rtol=1e-4)
    assert jnp.allclose(out_tiled, ref, atol=1e-4, rtol=1e-4)
    print("KERNEL_OK")
</pallas_src>

<mosaic_0001>
module attributes {stable_mosaic.version = 11 : i64} {
  func.func @_gln_fused_kernel(%arg0: i32, %arg1: memref<1x8x16xf32, #tpu.memory_space<vmem>>, %arg2: memref<8x1xf32, #tpu.memory_space<vmem>>, %arg3: memref<8x1xf32, #tpu.memory_space<vmem>>, %arg4: memref<1x8x16xf32, #tpu.memory_space<vmem>>) attributes {dimension_semantics = [#tpu.dimension_semantics<parallel>], iteration_bounds = array<i64: 2>, scalar_prefetch = 0 : i64, scratch_operands = 0 : i64, tpu.core_type = #tpu.core_type<tc>, window_params = [{transform_indices = @transform_0, window_bounds = array<i64: 1, 8, 16>}, {pipeline_mode = #tpu.pipeline_mode<synchronous>, transform_indices = @transform_1, window_bounds = array<i64: 8, 1>}, {pipeline_mode = #tpu.pipeline_mode<synchronous>, transform_indices = @transform_2, window_bounds = array<i64: 8, 1>}, {transform_indices = @transform_3, window_bounds = array<i64: 1, 8, 16>}]} {
    %c0 = arith.constant 0 : index
    %c0_0 = arith.constant 0 : index
    %c0_1 = arith.constant 0 : index
    %0 = vector.load %arg1[%c0, %c0_0, %c0_1] : memref<1x8x16xf32, #tpu.memory_space<vmem>>, vector<1x8x16xf32>
    %1 = vector.shape_cast %0 : vector<1x8x16xf32> to vector<1x1x8x16xf32>
    %cst = arith.constant dense<0.000000e+00> : vector<1xf32>
    %2 = vector.multi_reduction <add>, %1, %cst [1, 2, 3] : vector<1x1x8x16xf32> to vector<1xf32>
    %3 = vector.shape_cast %2 : vector<1xf32> to vector<1x1x1x1xf32>
    %4 = vector.extract %3[0, 0, 0, 0] : f32 from vector<1x1x1x1xf32>
    %5 = arith.mulf %0, %0 : vector<1x8x16xf32>
    %6 = vector.shape_cast %5 : vector<1x8x16xf32> to vector<1x1x8x16xf32>
    %cst_2 = arith.constant dense<0.000000e+00> : vector<1xf32>
    %7 = vector.multi_reduction <add>, %6, %cst_2 [1, 2, 3] : vector<1x1x8x16xf32> to vector<1xf32>
    %8 = vector.shape_cast %7 : vector<1xf32> to vector<1x1x1x1xf32>
    %9 = vector.extract %8[0, 0, 0, 0] : f32 from vector<1x1x1x1xf32>
    %cst_3 = arith.constant 1.280000e+02 : f32
    %10 = arith.divf %4, %cst_3 : f32
    %cst_4 = arith.constant 1.280000e+02 : f32
    %11 = arith.divf %9, %cst_4 : f32
    %12 = arith.mulf %10, %10 : f32
    %13 = arith.subf %11, %12 : f32
    %cst_5 = arith.constant 0.000000e+00 : f32
    %14 = arith.maximumf %13, %cst_5 : f32
    %cst_6 = arith.constant 9.99999974E-6 : f32
    %15 = arith.addf %14, %cst_6 : f32
    %16 = math.rsqrt %15 : f32
    %c0_7 = arith.constant 0 : index
    %c0_8 = arith.constant 0 : index
    %17 = vector.load %arg2[%c0_7, %c0_8] : memref<8x1xf32, #tpu.memory_space<vmem>>, vector<8x1xf32>
    %18 = vector.broadcast %16 : f32 to vector<8x1xf32>
    %19 = arith.mulf %17, %18 : vector<8x1xf32>
    %c0_9 = arith.constant 0 : index
    %c0_10 = arith.constant 0 : index
    %20 = vector.load %arg3[%c0_9, %c0_10] : memref<8x1xf32, #tpu.memory_space<vmem>>, vector<8x1xf32>
    %21 = vector.broadcast %10 : f32 to vector<8x1xf32>
    %22 = arith.mulf %21, %19 : vector<8x1xf32>
    %23 = arith.subf %20, %22 : vector<8x1xf32>
    %c0_11 = arith.constant 0 : index
    %c0_12 = arith.constant 0 : index
    %c0_13 = arith.constant 0 : index
    %24 = vector.load %arg1[%c0_11, %c0_12, %c0_13] : memref<1x8x16xf32, #tpu.memory_space<vmem>>, vector<1x8x16xf32>
    %25 = vector.shape_cast %19 : vector<8x1xf32> to vector<1x8x1xf32>
    %26 = vector.broadcast %25 : vector<1x8x1xf32> to vector<1x8x16xf32>
    %27 = arith.mulf %24, %26 : vector<1x8x16xf32>
    %28 = vector.shape_cast %23 : vector<8x1xf32> to vector<1x8x1xf32>
    %29 = vector.broadcast %28 : vector<1x8x1xf32> to vector<1x8x16xf32>
    %30 = arith.addf %27, %29 : vector<1x8x16xf32>
    %c0_14 = arith.constant 0 : index
    %c0_15 = arith.constant 0 : index
    %c0_16 = arith.constant 0 : index
    %31 = vector.load %arg4[%c0_14, %c0_15, %c0_16] : memref<1x8x16xf32, #tpu.memory_space<vmem>>, vector<1x8x16xf32>
    tpu.vector_store %arg4[%c0_14, %c0_15, %c0_16], %30 {strides = array<i32>} : memref<1x8x16xf32, #tpu.memory_space<vmem>>, vector<1x8x16xf32>,
    return
  }
  func.func @transform_0(%arg0: i32) -> (i32, i32, i32) {
    %c0_i32 = arith.constant 0 : i32
    %c0_i32_0 = arith.constant 0 : i32
    %c0_i32_1 = arith.constant 0 : i32
    return %arg0, %c0_i32, %c0_i32_0 : i32, i32, i32
  }
  func.func @transform_1(%arg0: i32) -> (i32, i32) {
    %c0_i32 = arith.constant 0 : i32
    %c0_i32_0 = arith.constant 0 : i32
    %c0_i32_1 = arith.constant 0 : i32
    return %c0_i32, %c0_i32_0 : i32, i32
  }
  func.func @transform_2(%arg0: i32) -> (i32, i32) {
    %c0_i32 = arith.constant 0 : i32
    %c0_i32_0 = arith.constant 0 : i32
    %c0_i32_1 = arith.constant 0 : i32
    return %c0_i32, %c0_i32_0 : i32, i32
  }
  func.func @transform_3(%arg0: i32) -> (i32, i32, i32) {
    %c0_i32 = arith.constant 0 : i32
    %c0_i32_0 = arith.constant 0 : i32
    %c0_i32_1 = arith.constant 0 : i32
    return %arg0, %c0_i32, %c0_i32_0 : i32, i32, i32
  }
}

</mosaic_0001>

<bundles_post_ra>
// kernel: tpu_custom_call.1
= control target key start
LH: loop header
LB: loop body
LE: loop exit
PB: predicated region body
PF: predicated region fallthrough
CT: control target
= control target key end

     0   :  { %8 = vsyncpa [#allocation3], 0  ;;  %s537_s0 = inlined_call_operand.vmem [shape: f32[2,8,16], index: 0, kind: input, shape index: {}]   ;;  %s538_s1 = inlined_call_operand.vmem [shape: f32[8,1], index: 1, kind: input, shape index: {}]   ;;  %s539_s2 = inlined_call_operand.vmem [shape: f32[8,1], index: 2, kind: input, shape index: {}]   ;;  %s540_s3 = inlined_call_operand.hbm [shape: f32[2,8,16], index: 3, kind: output, shape index: {}]  }
   0x1   :  { %10 = vsyncpa [#allocation3 + $0x1], 0  ;;  %s441_s12 = smov 0   ;;  %s443_s13 = smov 0  }
   0x2   :  { %s445_s14 = smov 0   ;;  %s447_s15 = smov 0  }
   0x3 LB: > { %s462_s16 = sadd.s32 4294967295, %s416_s15   ;;  %s295_s17 = sadd.s32 4294967294, %s416_s15   ;;  %s416_s15 = sphi %s447_s15, %s546_s15   ;;  %s412_s14 = sphi %s445_s14, %s545_s14   ;;  %s408_s13 = sphi %s443_s13, %s544_s13   ;;  %s404_s12 = sphi %s441_s12, %s543_s12  }
   0x4   : > { %s466_s18 = sadd.s32 1, %s416_s15   ;;  %s91_s19 = sadd.s32 1, %s412_s14 }
   0x5   : > { %s88_s20 = ssub.s32 %s416_s15, %s466_s18  ;;  %p101_p0 = scmp.ne.s32.totalorder %s412_s14, %s408_s13 }
   0x6   : > { %p89_p1 = scmp.eq.s32.totalorder %s88_s20, 0  ;;  %p102_p2 = scmp.eq.s32.totalorder %s462_s16, 1 }
   0x7   : > { %p107_p3 = scmp.ne.s32.totalorder %s408_s13, %s404_s12  ;;  %p108_p4 = scmp.eq.s32.totalorder %s295_s17, 1 }
   0x8   : > { %s477_s21 = scalar_select %p89_p1, %s412_s14, %s91_s19  }
   0x9   : > { %p479_p5 = por %p102_p2, %p101_p0  ;;  %p483_p6 = por %p108_p4, %p107_p3 }
   0xa   : > { %p298_p7 = scmp.ge.s32.totalorder %s416_s15, 1  ;;  %p139_p8 = scmp.lt.s32.totalorder %s416_s15, 3 }
   0xc   : > { %p140_p9 = pnand %p298_p7, %p139_p8 }
   0xd   : > { %p162_p10 = scmp.lt.s32.totalorder (!%p140_p9), %s462_s16, 1  ;;  %s419_s8 = smov (!%p140_p9), 0.0  }
   0xe   : > { %143 = sbr.rel (%p140_p9) target bundleno = 447 (0x1bf), region = 32  ;;  %s302_s27 = sshll.u32 (!%p140_p9), %s462_s16, 7 }
  0x13   : > { %s163_s24 = scalar_select %p162_p10, %s462_s16, 1  ;;  %vm167_vm0 = vcmask 130048   ;;  %v418_v17 = vmov 0   ;;  %v202_v21 = vld [vmem:[%s538_s1] sm:$0xff] }
  0x14   : > { %352 = vset.pattern.permute.xlu1 %v418_v17  ;;  %353 = vset.pattern.permute.xlu0 %v418_v17  ;;  %v205_v25 = vld [vmem:[%s539_s2] sm:$0xff] }
  0x15   : > { %s300_s25 = sshll.u32 %s163_s24, 3 }
  0x16   : > { %s165_s28 = scalar_lea.vmem %s537_s0, %s300_s25  ;;  %s159_s25 = sand.u32 1, %s408_s13  }
  0x17   : > { %v166_v0 = vld [vmem:[%s165_s28] sm:$0xff]  ;;  %s299_s26 = sshll.u32 %s159_s25, 3 }
  0x18   : > { %v168_v1 = vsel %vm167_vm0, %v166_v0, 0.0  ;;  %v178_v2 = vmul.f32 %v166_v0, %v166_v0  ;;  %s161_s28 = scalar_lea.vmem [#allocation2], %s299_s26 }
  0x19   : > { %169 = vadd.xlane.f32.xlu0 %v168_v1 }
  0x1a   : > { %v179_v3 = vsel %vm167_vm0, %v178_v2, 0.0 }
  0x1d   : > { %180 = vadd.xlane.f32.xlu0 %v179_v3 }
  0xa2   : > { %v170_v4 = vpop.xlane.xlu0 %169 }
  0xa3   : > { %v171_v5 = vrot.slane %v170_v4, 4 }
  0xa5   : > { %v172_v6 = vadd.f32 %v171_v5, %v170_v4 }
  0xa6   : > { %v181_v7 = vpop.xlane.xlu0 %180 }
  0xa7   : > { %v173_v8 = vrot.slane %v172_v6, 2  ;;  %v182_v9 = vrot.slane %v181_v7, 4 }
  0xa9   : > { %v183_v10 = vadd.f32 %v182_v9, %v181_v7  ;;  %v174_v11 = vadd.f32 %v173_v8, %v172_v6 }
  0xab   : > { %v184_v12 = vrot.slane %v183_v10, 2  ;;  %v175_v13 = vrot.slane %v174_v11, 1 }
  0xad   : > { %v185_v14 = vadd.f32 %v184_v12, %v183_v10  ;;  %v176_v15 = vadd.f32 %v175_v13, %v174_v11 }
  0xaf   : > { %305 = vpush %v176_v15  ;;  %v186_v16 = vrot.slane %v185_v14, 1 }
  0xb1   : > { %v187_v18 = vadd.f32 %v186_v16, %v185_v14 }
  0xb3   : > { %307 = vpush %v187_v18 }
  0xe0   : > { %s306_s29 = spop %305 }
  0xe1   : > { %s191_s30 = smul.f32 0.0078125, %s306_s29  ;;  %s236_s29 = sshll.u32 %s161_s28, 4  ;;  %s237_s29 = int_to_ptr.vmem [resolvable:$true] %s236_s29 }
  0xe3   : > { %s195_s4 = smul.f32 %s191_s30, %s191_s30  ;;  %v206_v24 = vstv %s191_s30 }
  0xe4   : > { %s308_s5 = spop %307 }
  0xe5   : > { %s194_s6 = smul.f32 0.0078125, %s308_s5  ;;  %s234_s5 = scalar_lea.hbm %s540_s3, %s302_s27 }
  0xe7   : > { %s196_s7 = ssub.f32 %s194_s6, %s195_s4  ;;  %s223_s6 = scalar_lea.sflag [#allocation3], %s159_s25 }
  0xe9   : > { %s197_s9 = smax.f32 %s419_s8, %s196_s7  ;;  %s356_s7 = scalar_lea.vmem %s237_s29, 128 }
  0xea   : > { %s198_s10 = sadd.f32 1e-05, %s197_s9  ;;  %p357_p11 = scmp.ne.s32.totalorder %s237_s29, %s356_s7 }
  0xeb   : > { %s420_s8 = smov [#allocation2]  }
  0xec   : > { %v199_v19 = vstv %s198_s10  ;;  %p358_p12 = pnand %p357_p11, %p479_p5  ;;  %s360_s16 = sshll.u32 %s420_s8, 4  ;;  %s361_s16 = int_to_ptr.vmem [resolvable:$false] %s360_s16 }
  0xed   : > { %354 = vrsqrt.f32 %v199_v19  ;;  %s362_s9 = scalar_lea.vmem %s361_s16, 256  ;;  %p363_p0 = scmp.lt.s32.totalorder %s237_s29, %s361_s16 }
  0xee   : > { %p359_p13 = pneg %p358_p12  ;;  %p364_p1 = scmp.lt.s32.totalorder %s362_s9, %s356_s7 }
  0xf0   : > { %p365_p2 = por %p364_p1, %p363_p0 }
  0xf2   : > { %p366_p3 = pnand %p365_p2, %p359_p13 }
  0xfa   : > { %v355_v20 = vpop.eup %354 }
  0xfb   : > { %309 = vpush %v355_v20 }
 0x12c   : > { %s310_s19 = spop %309 }
 0x12d   : > { %v203_v22 = vstv %s310_s19 }
 0x12e   : > { %v204_v23 = vmul.f32 %v203_v22, %v202_v21 }
 0x130   : > { %v207_v26 = vmul.f32 %v206_v24, %v204_v23  ;;  %211 = vperm.xlu1 %352, %v204_v23  }
 0x132   : > { %v208_v27 = vsub.f32 %v205_v25, %v207_v26 }
 0x134   : > { %217 = vperm.xlu1 %352, %v208_v27  }
 0x1ab   : > { %v212_v28 = vpop.permute.xlu1 %211 }
 0x1ac   : > { %v214_v29 = vmul.f32 %v212_v28, %v166_v0 }
 0x1af   : > { %v218_v30 = vpop.permute.xlu1 %217 }
 0x1b0   : > { %v220_v31 = vadd.f32 %v218_v30, %v214_v29 }
 0x1b2   : > { %221 = vst.msk [vmem:[%s161_s28] sm:$0xff] %vm167_vm0, %v220_v31 }
 0x1b3   : > { %369 = shalt.err (!%p366_p3)
}
 0x1b4   : > { %s370_s10 = scalar_lea.hbm %s234_s5, 128  ;;  %s374_s19 = scalar_lea.hbm %s540_s3, 256 }
 0x1b5   : > { %p371_p4 = scmp.ne.s32.totalorder %s234_s5, %s370_s10  ;;  %p375_p9 = scmp.lt.s32.totalorder %s234_s5, %s540_s3 }
 0x1b6   : > { %p376_p10 = scmp.lt.s32.totalorder %s374_s19, %s370_s10 }
 0x1b7   : > { %p372_p7 = pnand %p371_p4, %p479_p5 }
 0x1b8   : > { %p377_p11 = por %p376_p10, %p375_p9 }
 0x1b9   : > { %p373_p8 = pneg %p372_p7 }
 0x1bb   : > { %p378_p12 = pnand %p377_p11, %p373_p8 }
 0x1bd   : > { %381 = shalt.err (!%p378_p12)
}
 0x1be   : > { %311 = dma.vmem_to_hbm [thread:$0]  (%p479_p5), %s237_s29, 128, %s234_s5, %s223_s6  }
 0x1bf PF: > { %p317_p13 = scmp.ge.s32.totalorder %s416_s15, 2  ;;  %s248_s25 = sand.u32 1, %s404_s12  }
 0x1c0   : > { %s249_s26 = scalar_lea.sflag [#allocation3], %s248_s25 }
 0x1c1   : > { %p314_p0 = pnand %p317_p13, %p483_p6 }
 0x1c3   : > { %p315_p1 = pneg %p314_p0 }
 0x1c5   : > { %399 = dma.done.wait (%p315_p1), %s249_s26, 128  }
 0x1c6   : > { %401 = vsyncadd (%p315_p1), %s249_s26, 4294967168  ;;  %p13_p2 = scmp.ge.s32.totalorder %s466_s18, 4   ;;  %s543_s12 = smov %s408_s13 }
 0x1c7   : > { %s544_s13 = smov %s412_s14  ;;  %s545_s14 = smov %s477_s21 }
 0x1c8   : > { %s546_s15 = smov %s466_s18  ;;  %15 = sbr.rel (!%p13_p2) target bundleno = 3 (0x3), region = 67 }
 0x1cd   :  { %254 = vsyncpa [#allocation3], 1 }
 0x1ce   :  { %256 = vsyncpa [#allocation3 + $0x1], 1 }

</bundles_post_ra>
